<compile_context>
chip_gen: v7x
topology: tpu7x:2x2x1
jax: 0.10.0
libtpu: 0.0.40
codegen_flags: <defaults>
</compile_context>

<pallas_src>
import functools
import math

import jax
import jax.numpy as jnp
from jax.experimental import pallas as pl
from jax.experimental.pallas import tpu as pltpu


_LANE_WIDTH = 512       # lane-dense last dim (multiple of 128): long unmasked stores
_MAX_TILE_ROWS = 2048   # 2048x512 tile => ~10 MiB double-buffered (int8 in + f32 out)
_TARGET_STEPS = 8       # aim for >= 8 pipelined grid steps on medium/large arrays


def _cdiv(a, b):
    return -(-a // b)


def _round_up(x, m):
    return ((x + m - 1) // m) * m


def _choose_tile_rows(rows):
    """Pick the row tile so the grid pipelines (>=2 steps) and splits across TCs."""
    if rows <= 16:
        # Tiny slab: single block equal to the full array dims (always legal).
        return rows
    steps_target = max(_TARGET_STEPS, _cdiv(rows, _MAX_TILE_ROWS))
    tile = min(_MAX_TILE_ROWS, max(8, _round_up(_cdiv(rows, steps_target), 8)))
    # Prefer an even step count so v7x's two TensorCores get equal work.
    for cand in (tile, tile - 8, tile + 8):
        if 8 <= cand <= _MAX_TILE_ROWS:
            steps = _cdiv(rows, cand)
            if steps >= 2 and steps % 2 == 0:
                return cand
    return tile


def _dequant_kernel(min_step_ref, q_ref, o_ref, *, bits):
    # min_step_ref: SMEM float32[2] -> (min, step); q_ref: integer-code tile (VMEM)
    offset = jnp.float32(2 ** (bits - 1))
    mn = min_step_ref[0]
    step = min_step_ref[1]
    # Same op order as DequantizationonGPU: (q + 2^(bits-1)) * step + min
    o_ref[...] = ((q_ref[...].astype(jnp.float32) + offset) * step + mn).astype(o_ref.dtype)


def qrecv_dequant(codes, min_step, bits, *, out_dtype=jnp.float32):
    """Dequantize received codes: (codes + 2^(bits-1)) * step + min."""
    # TODO(synk): emit bf16 (out_dtype=jnp.bfloat16) or fuse this dequant into the
    # consumer's input pipeline to cut the f32 HBM writeback (4 of the ~5 B/elem);
    # f32 kept as the default to match DequantizationonGPU (torch FloatTensor).
    orig_shape = codes.shape
    total = math.prod(orig_shape)
    width = _LANE_WIDTH
    rows = _cdiv(total, width)
    padded_total = rows * width
    ragged = padded_total != total

    flat = codes.reshape(-1)
    if ragged:
        # TODO(synk): keep the padded flat layout downstream so this <=511-elem pad
        # and the tail slice below fuse away on ragged sizes; both vanish when
        # total % 512 == 0 (the common activation case).
        flat = jnp.pad(flat, (0, padded_total - total))
    codes2d = flat.reshape(rows, width)

    tile_rows = _choose_tile_rows(rows)
    grid = (_cdiv(rows, tile_rows),)          # partial last block handled by Pallas
    in_itemsize = jnp.dtype(codes.dtype).itemsize
    out_itemsize = jnp.dtype(out_dtype).itemsize

    out2d = pl.pallas_call(
        functools.partial(_dequant_kernel, bits=bits),
        grid=grid,
        out_shape=jax.ShapeDtypeStruct((rows, width), out_dtype),
        in_specs=[
            pl.BlockSpec(memory_space=pltpu.MemorySpace.SMEM),    # (min, step) scalars
            pl.BlockSpec((tile_rows, width), lambda i: (i, 0)),   # code tiles
        ],
        out_specs=pl.BlockSpec((tile_rows, width), lambda i: (i, 0)),
        compiler_params=pltpu.CompilerParams(
            dimension_semantics=("parallel",),   # shard tiles across v7x's two TCs
            vmem_limit_bytes=32 * 1024 * 1024,   # explicit headroom for 2048-row tiles
        ),
        cost_estimate=pl.CostEstimate(
            flops=3 * padded_total,
            transcendentals=0,
            bytes_accessed=padded_total * (in_itemsize + out_itemsize) + 8,
        ),
    )(min_step.astype(jnp.float32), codes2d)

    out = out2d.reshape(-1)
    if ragged:
        out = out[:total]
    return out.reshape(orig_shape)


class QRecvLayerGloo:
    """JAX/Pallas port of the PyTorch QRecvLayerGloo module (forward only)."""

    def __init__(self, bits, recv_rank, rank):
        self.bits = bits
        self.recv_rank = recv_rank
        self.rank = rank
        # matches torch.tensor([0.0, 0.0]) in __init__
        self.min_step = jnp.zeros((2,), jnp.float32)

    def forward(self, recv_codes, min_step):
        # TODO(synk): dist.recv / Gloo point-to-point (and the backward-path
        # quantize+send) have no Pallas equivalent; `recv_codes` and `min_step`
        # stand in for the buffers the recv would fill.
        return qrecv_dequant(recv_codes, min_step, self.bits)


def _quantize_ref(act, bits):
    """Simulate the sender's Quantization2CPU so (min, step, codes) are realistic."""
    a_min = jnp.min(act)
    a_max = jnp.max(act)
    step = (a_max - a_min) / (2 ** bits - 1)
    step = jnp.where(step == 0, jnp.float32(1.0), step)   # guard constant activations
    codes_f = jnp.round((act - a_min) / step - 2 ** (bits - 1))
    codes = codes_f.astype(jnp.int8)
    min_step = jnp.stack([a_min, step]).astype(jnp.float32)
    return codes, min_step


def _check(layer, act, bits):
    codes, min_step = _quantize_ref(act, bits)            # what dist.recv would deliver
    out = jax.block_until_ready(layer.forward(codes, min_step))
    ref = (codes.astype(jnp.float32) + 2 ** (bits - 1)) * min_step[1] + min_step[0]
    assert out.shape == act.shape
    assert out.dtype == jnp.float32
    assert jnp.allclose(out, ref, atol=1e-6, rtol=1e-6), f"mismatch for shape {act.shape}"


if __name__ == "__main__":
    bits = 8
    layer = QRecvLayerGloo(bits=bits, recv_rank=0, rank=1)
    key = jax.random.PRNGKey(0)
    k1, k2, k3, k4 = jax.random.split(key, 4)

    # Case 1: NCHW [2, 4, 16, 16] — 2048 elems, zero-copy (no pad / no slice) path.
    _check(layer, jax.random.normal(k1, (2, 4, 16, 16), dtype=jnp.float32), bits)

    # Case 2: odd element count (1155) — tail-padding + slice path, single block.
    _check(layer, jax.random.normal(k2, (3, 5, 7, 11), dtype=jnp.float32), bits)

    # Case 3: [4, 8, 32, 32] — 32768 elems, multi-step pipelined grid (8 even steps).
    _check(layer, jax.random.normal(k3, (4, 8, 32, 32), dtype=jnp.float32), bits)

    # Case 4: ragged 51153 elems — partial last block + tail-padding path.
    _check(layer, jax.random.normal(k4, (3, 17, 17, 59), dtype=jnp.float32), bits)

    print("KERNEL_OK")
</pallas_src>

<mosaic_0001>
module attributes {stable_mosaic.version = 11 : i64} {
  func.func @_dequant_kernel(%arg0: i32, %arg1: memref<2xf32, #tpu.memory_space<smem>>, %arg2: memref<4x512xi8, #tpu.memory_space<vmem>>, %arg3: memref<4x512xf32, #tpu.memory_space<vmem>>) attributes {dimension_semantics = [#tpu.dimension_semantics<parallel>], iteration_bounds = array<i64: 1>, scalar_prefetch = 0 : i64, scratch_operands = 0 : i64, tpu.core_type = #tpu.core_type<tc>, window_params = [{transform_indices = @transform_0, window_bounds = array<i64: 2>}, {transform_indices = @transform_1, window_bounds = array<i64: 4, 512>}, {transform_indices = @transform_2, window_bounds = array<i64: 4, 512>}]} {
    %c0 = arith.constant 0 : index
    %0 = memref.load %arg1[%c0] : memref<2xf32, #tpu.memory_space<smem>>
    %c1 = arith.constant 1 : index
    %1 = memref.load %arg1[%c1] : memref<2xf32, #tpu.memory_space<smem>>
    %c0_0 = arith.constant 0 : index
    %c0_1 = arith.constant 0 : index
    %2 = vector.load %arg2[%c0_0, %c0_1] : memref<4x512xi8, #tpu.memory_space<vmem>>, vector<4x512xi8>
    %3 = arith.sitofp %2 : vector<4x512xi8> to vector<4x512xf32>
    %cst = arith.constant 1.280000e+02 : f32
    %4 = vector.broadcast %cst : f32 to vector<4x512xf32>
    %5 = arith.addf %3, %4 : vector<4x512xf32>
    %6 = vector.broadcast %1 : f32 to vector<4x512xf32>
    %7 = arith.mulf %5, %6 : vector<4x512xf32>
    %8 = vector.broadcast %0 : f32 to vector<4x512xf32>
    %9 = arith.addf %7, %8 : vector<4x512xf32>
    %c0_2 = arith.constant 0 : index
    %c0_3 = arith.constant 0 : index
    %10 = vector.load %arg3[%c0_2, %c0_3] : memref<4x512xf32, #tpu.memory_space<vmem>>, vector<4x512xf32>
    tpu.vector_store %arg3[%c0_2, %c0_3], %9 {strides = array<i32>} : memref<4x512xf32, #tpu.memory_space<vmem>>, vector<4x512xf32>,
    return
  }
  func.func @transform_0(%arg0: i32) -> i32 {
    %c0_i32 = arith.constant 0 : i32
    %c0_i32_0 = arith.constant 0 : i32
    return %c0_i32 : i32
  }
  func.func @transform_1(%arg0: i32) -> (i32, i32) {
    %c0_i32 = arith.constant 0 : i32
    %c0_i32_0 = arith.constant 0 : i32
    return %arg0, %c0_i32 : i32, i32
  }
  func.func @transform_2(%arg0: i32) -> (i32, i32) {
    %c0_i32 = arith.constant 0 : i32
    %c0_i32_0 = arith.constant 0 : i32
    return %arg0, %c0_i32 : i32, i32
  }
}

</mosaic_0001>

<bundles_post_ra>
// kernel: tpu_custom_call.1
= control target key start
LH: loop header
LB: loop body
LE: loop exit
PB: predicated region body
PF: predicated region fallthrough
CT: control target
= control target key end

     0   :  { %7 = vsyncpa [#allocation5], 0  ;;  %s186_s0 = inlined_call_operand.hbm [shape: f32[2], index: 0, kind: input, shape index: {}]   ;;  %s187_s1 = inlined_call_operand.hbm [shape: s8[4,512], index: 1, kind: input, shape index: {}]   ;;  %s188_s2 = inlined_call_operand.hbm [shape: f32[4,512], index: 2, kind: output, shape index: {}]  }
   0x1   :  { %8 = vsyncpa [#allocation3], 0 }
   0x2   :  { %9 = vsyncpa [#allocation4], 0  ;;  %s72_s11 = scalar_lea.hbm %s186_s0, 16 }
   0x3   :  { %p73_p0 = scmp.ne.s32.totalorder %s186_s0, %s72_s11  ;;  %p76_p1 = scmp.lt.u32.totalorder %s72_s11, %s186_s0 }
   0x5   :  { %p78_p2 = pnand %p76_p1, %p73_p0 }
   0x7   :  { %81 = shalt.err (!%p78_p2)
}
   0x8   :  { %s132_s16 = smov [#allocation2]   ;;  %s133_s19 = smov [#allocation6]  }
   0x9   :  { %17 = dma.hbm_to_smem %s186_s0, 16, %s132_s16, [#allocation5]  }
   0xa   :  { %s24_s20 = sshll.u32 %s133_s19, 4  ;;  %s82_s23 = scalar_lea.hbm %s187_s1, 64  ;;  %s25_s20 = int_to_ptr.vmem [resolvable:$true] %s24_s20 }
   0xb   :  { %p83_p3 = scmp.ne.s32.totalorder %s187_s1, %s82_s23  ;;  %p86_p4 = scmp.lt.u32.totalorder %s82_s23, %s187_s1 }
   0xd   :  { %p88_p5 = pnand %p86_p4, %p83_p3 }
   0xf   :  { %91 = shalt.err (!%p88_p5)
}
  0x10   :  { %s92_s28 = scalar_lea.vmem %s25_s20, 64  ;;  %p97_p7 = scmp.lt.s32.totalorder %s25_s20, %s25_s20 }
  0x11   :  { %p93_p6 = scmp.ne.s32.totalorder %s25_s20, %s92_s28  ;;  %p98_p8 = scmp.lt.s32.totalorder %s92_s28, %s92_s28 }
  0x13   :  { %p99_p9 = por %p98_p8, %p97_p7 }
  0x15   :  { %p100_p10 = pnand %p99_p9, %p93_p6 }
  0x17   :  { %103 = shalt.err (!%p100_p10)
}
  0x18   :  { %27 = dma.hbm_to_vmem [thread:$0]  %s187_s1, 64, %s25_s20, [#allocation3]  }
  0x19   :  { %126 = dma.done.wait [#allocation5], 16  }
  0x1a   :  { %127 = vsyncadd [#allocation5], 4294967280 }
  0x1b   :  { %128 = dma.done.wait [#allocation3], 64  }
  0x1c   :  { %129 = vsyncadd [#allocation3], 4294967232 }
  0x1d   :  { %34 = sfence }
  0x1e   :  { %s35_s30 = sld [smem:[#allocation2]]  ;;  %s68_s3 = sld [smem:[#allocation2 + $0x1]]  ;;  %v37_v0 = vld [vmem:[#allocation6] sm:$0xf] }
  0x1f   :  { %v38_v1 = vunpack.c.0.s8 %v37_v0  ;;  %v39_v2 = vunpack.c.1.s8 %v37_v0  ;;  %s134_s4 = smov [#allocation7]  }
  0x20   :  { %s58_s5 = sshll.u32 %s134_s4, 4  ;;  %s59_s5 = int_to_ptr.vmem [resolvable:$true] %s58_s5 }
  0x21   :  { %v40_v3 = vcvt.s32.f32 %v38_v1  ;;  %v41_v4 = vcvt.s32.f32 %v39_v2  ;;  %s104_s1 = scalar_lea.vmem %s59_s5, 256  ;;  %p109_p12 = scmp.lt.s32.totalorder %s59_s5, %s59_s5 }
  0x22   :  { %p105_p11 = scmp.ne.s32.totalorder %s59_s5, %s104_s1  ;;  %p110_p13 = scmp.lt.s32.totalorder %s104_s1, %s104_s1 }
  0x23   :  { %v42_v5 = vadd.f32 128.0, %v40_v3  ;;  %v43_v6 = vadd.f32 128.0, %v41_v4 }
  0x24   :  { %v44_v7 = vstv %s68_s3  ;;  %v47_v8 = vstv %s35_s30  ;;  %p111_p0 = por %p110_p13, %p109_p12 }
  0x25   :  { %v45_v9 = vmul.f32 %v44_v7, %v42_v5  ;;  %v46_v10 = vmul.f32 %v44_v7, %v43_v6 }
  0x26   :  { %p112_p1 = pnand %p111_p0, %p105_p11 }
  0x27   :  { %v48_v11 = vadd.f32 %v47_v8, %v45_v9  ;;  %v49_v12 = vadd.f32 %v47_v8, %v46_v10 }
  0x29   :  { %50 = vst [vmem:[#allocation7] sm:$0xff] %v48_v11  ;;  %51 = vst [vmem:[#allocation7 + $0x8] sm:$0xff] %v49_v12 }
  0x2a   :  { %115 = shalt.err (!%p112_p1)
}
  0x2b   :  { %s116_s8 = scalar_lea.hbm %s188_s2, 256 }
  0x2c   :  { %p117_p2 = scmp.ne.s32.totalorder %s188_s2, %s116_s8  ;;  %p120_p3 = scmp.lt.u32.totalorder %s116_s8, %s188_s2 }
  0x2e   :  { %p122_p4 = pnand %p120_p3, %p117_p2 }
  0x30   :  { %125 = shalt.err (!%p122_p4)
}
  0x31   :  { %61 = dma.vmem_to_hbm [thread:$0]  %s59_s5, 256, %s188_s2, [#allocation4]  }
  0x32   :  { %130 = dma.done.wait [#allocation4], 256  }
  0x33   :  { %131 = vsyncadd [#allocation4], 4294967040 }
  0x34   :  { %65 = vsyncpa [#allocation3], 1 }
  0x35   :  { %66 = vsyncpa [#allocation4], 1 }
  0x36   :  { %67 = vsyncpa [#allocation5], 1 }

</bundles_post_ra>
